<compile_context>
chip_gen: v7x
topology: tpu7x:2x2x1
jax: 0.10.0
libtpu: 0.0.40
codegen_flags: <defaults>
</compile_context>

<pallas_src>
import jax
import jax.numpy as jnp
from jax import lax
from jax.experimental import pallas as pl
from jax.experimental.pallas import tpu as pltpu

# ---- small, module-consistent config ----
HIDDEN = 32
NUM_HEADS = 4
HEAD_DIM = HIDDEN // NUM_HEADS        # 8
BOND_DIM = 8
SEQ = 8
BATCH = 2
SCALE = 1.0 / float(HEAD_DIM) ** 0.5
NB = NUM_HEADS * BOND_DIM             # 32  (compressed q/k width)
PACKED = 3 * HIDDEN                   # 96  ([q|k|v] packed lane width)
ROWS_TARGET = 256                     # rows per grid step once B*S grows


# ------------------------------------------------------------------
# Fused kernel for one row-block of `batches_per_block` sequences:
#   x_ref    : (R, 96)   packed [q|k|v] rows, bf16
#   wqkv_ref : (96, 96)  block-diag(wqc*scale, wkc, wv), bf16
#   wo_ref   : (32, 32)  output projection, f32
#   bo_ref   : (1, 32)   output bias, f32
#   o_ref    : (R, 32)   f32
# ------------------------------------------------------------------
def _make_kernel(batches_per_block):
    def kernel(x_ref, wqkv_ref, wo_ref, bo_ref, o_ref):
        # Single fused projection: qc | kc | v in one MXU matmul, f32 accumulate.
        proj = jnp.dot(x_ref[...], wqkv_ref[...],
                       preferred_element_type=jnp.float32)          # (R, 96)

        ctx_rows = []
        for bb in range(batches_per_block):                          # static unroll
            r0 = bb * SEQ
            head_ctx = []
            for h in range(NUM_HEADS):                                # static unroll
                qb = proj[r0:r0 + SEQ, h * BOND_DIM:(h + 1) * BOND_DIM]          # (S, BOND)
                kb = proj[r0:r0 + SEQ, NB + h * BOND_DIM:NB + (h + 1) * BOND_DIM]
                vb = proj[r0:r0 + SEQ, 2 * NB + h * HEAD_DIM:2 * NB + (h + 1) * HEAD_DIM]

                # scores = qb @ kb^T (scale pre-folded into wqc); contract last
                # dims directly -> no explicit transpose.
                s = lax.dot_general(qb, kb, (((1,), (1,)), ((), ())),
                                    preferred_element_type=jnp.float32)  # (S, S)
                m = jnp.max(s, axis=-1, keepdims=True)
                e = jnp.exp(s - m)
                w = e * pl.reciprocal(jnp.sum(e, axis=-1, keepdims=True),
                                      approx=True)
                # dropout: eval-mode identity
                head_ctx.append(jnp.dot(w, vb,
                                        preferred_element_type=jnp.float32))  # (S, D)
            ctx_rows.append(jnp.concatenate(head_ctx, axis=-1))       # (S, HIDDEN)

        ctx = ctx_rows[0] if len(ctx_rows) == 1 else jnp.concatenate(ctx_rows, axis=0)

        # Output projection + bias; single HBM write for the block.
        o_ref[...] = (jnp.dot(ctx, wo_ref[...],
                              preferred_element_type=jnp.float32)
                      + bo_ref[...])
    return kernel


def _pick_rows_per_block(total_rows):
    """Largest multiple of SEQ that divides total_rows, capped at ROWS_TARGET."""
    best = SEQ
    r = SEQ
    while r <= min(total_rows, ROWS_TARGET):
        if total_rows % r == 0:
            best = r
        r += SEQ
    return best


def mps_attention_fused(x_packed, wqkv, wo, bo2d):
    total_rows = x_packed.shape[0]
    rows_per_block = _pick_rows_per_block(total_rows)
    batches_per_block = rows_per_block // SEQ
    grid = (total_rows // rows_per_block,)

    return pl.pallas_call(
        _make_kernel(batches_per_block),
        out_shape=jax.ShapeDtypeStruct((total_rows, HIDDEN), jnp.float32),
        grid=grid,
        in_specs=[
            pl.BlockSpec((rows_per_block, PACKED), lambda i: (i, 0)),   # packed q|k|v
            pl.BlockSpec((PACKED, PACKED), lambda i: (0, 0)),           # block-diag W
            pl.BlockSpec((HIDDEN, HIDDEN), lambda i: (0, 0)),           # wo
            pl.BlockSpec((1, HIDDEN), lambda i: (0, 0)),                # bo
        ],
        out_specs=pl.BlockSpec((rows_per_block, HIDDEN), lambda i: (i, 0)),
        compiler_params=pltpu.CompilerParams(
            dimension_semantics=("parallel",)),
    )(x_packed, wqkv, wo, bo2d)


# ------------------------------------------------------------------
# Parameter construction (deterministic, synthetic).  Bond compression and the
# 1/sqrt(head_dim) scale are folded into the q/k projection weights; the three
# projections are packed into one block-diagonal (96, 96) bf16 weight.
# ------------------------------------------------------------------
def init_params(key):
    ks = jax.random.split(key, 7)
    xav = 1.0 / float(HIDDEN) ** 0.5
    wq = jax.random.normal(ks[0], (HIDDEN, HIDDEN), jnp.float32) * xav
    wk = jax.random.normal(ks[1], (HIDDEN, HIDDEN), jnp.float32) * xav
    wv = jax.random.normal(ks[2], (HIDDEN, HIDDEN), jnp.float32) * xav
    # compression matrices, pre-transposed as (head_dim, bond_dim)
    cq_t = jax.random.normal(ks[3], (HEAD_DIM, BOND_DIM), jnp.float32)
    ck_t = jax.random.normal(ks[4], (HEAD_DIM, BOND_DIM), jnp.float32)
    wo = jax.random.normal(ks[5], (HIDDEN, HIDDEN), jnp.float32) * xav
    bo = jax.random.normal(ks[6], (HIDDEN,), jnp.float32) * 0.01

    def fold(w, c_t):
        # wfold[:, h*BOND:(h+1)*BOND] = w[:, h*D:(h+1)*D] @ c_t   (exact)
        w3 = w.reshape(HIDDEN, NUM_HEADS, HEAD_DIM)
        return jnp.einsum("hnd,db->hnb", w3, c_t).reshape(HIDDEN, NB)

    wqc = fold(wq, cq_t) * SCALE          # scale folded here (exact)
    wkc = fold(wk, ck_t)

    wqkv = jnp.zeros((PACKED, PACKED), jnp.float32)
    wqkv = wqkv.at[0:HIDDEN, 0:NB].set(wqc)
    wqkv = wqkv.at[HIDDEN:2 * HIDDEN, NB:2 * NB].set(wkc)
    wqkv = wqkv.at[2 * HIDDEN:3 * HIDDEN, 2 * NB:2 * NB + HIDDEN].set(wv)

    return {
        "wqkv": wqkv.astype(jnp.bfloat16),   # bf16 MXU operand, f32 accumulation
        "wo": wo,
        "bo": bo,
    }


# ------------------------------------------------------------------
# Full forward (only free reshapes + one concat/cast outside the single kernel)
# ------------------------------------------------------------------
@jax.jit
def mps_attention_forward(params, query, key, value):
    B, S, H = query.shape
    x_packed = jnp.concatenate(
        [query.reshape(B * S, H), key.reshape(B * S, H), value.reshape(B * S, H)],
        axis=-1).astype(jnp.bfloat16)                    # (B*S, 96), bf16
    out2d = mps_attention_fused(
        x_packed, params["wqkv"], params["wo"], params["bo"].reshape(1, H))
    # return_attention_weights=False path of the torch module.
    return out2d.reshape(B, S, H), None


if __name__ == "__main__":
    root = jax.random.PRNGKey(0)
    k_param, k_q, k_k, k_v = jax.random.split(root, 4)

    params = init_params(k_param)
    query = jax.random.normal(k_q, (BATCH, SEQ, HIDDEN), jnp.float32)
    key = jax.random.normal(k_k, (BATCH, SEQ, HIDDEN), jnp.float32)
    value = jax.random.normal(k_v, (BATCH, SEQ, HIDDEN), jnp.float32)

    out, attn_w = mps_attention_forward(params, query, key, value)
    out = jax.block_until_ready(out)

    assert out.shape == (BATCH, SEQ, HIDDEN)
    assert attn_w is None
    assert bool(jnp.all(jnp.isfinite(out)))
    print("KERNEL_OK")
</pallas_src>

<mosaic_0001>
module attributes {stable_mosaic.version = 11 : i64} {
  func.func @kernel(%arg0: i32, %arg1: memref<16x96xbf16, #tpu.memory_space<vmem>>, %arg2: memref<96x96xbf16, #tpu.memory_space<vmem>>, %arg3: memref<32x32xf32, #tpu.memory_space<vmem>>, %arg4: memref<1x32xf32, #tpu.memory_space<vmem>>, %arg5: memref<16x32xf32, #tpu.memory_space<vmem>>) attributes {dimension_semantics = [#tpu.dimension_semantics<parallel>], iteration_bounds = array<i64: 1>, scalar_prefetch = 0 : i64, scratch_operands = 0 : i64, tpu.core_type = #tpu.core_type<tc>, window_params = [{transform_indices = @transform_0, window_bounds = array<i64: 16, 96>}, {pipeline_mode = #tpu.pipeline_mode<synchronous>, transform_indices = @transform_1, window_bounds = array<i64: 96, 96>}, {pipeline_mode = #tpu.pipeline_mode<synchronous>, transform_indices = @transform_2, window_bounds = array<i64: 32, 32>}, {pipeline_mode = #tpu.pipeline_mode<synchronous>, transform_indices = @transform_3, window_bounds = array<i64: 1, 32>}, {transform_indices = @transform_4, window_bounds = array<i64: 16, 32>}]} {
    %c0 = arith.constant 0 : index
    %c0_0 = arith.constant 0 : index
    %0 = vector.load %arg1[%c0, %c0_0] : memref<16x96xbf16, #tpu.memory_space<vmem>>, vector<16x96xbf16>
    %c0_1 = arith.constant 0 : index
    %c0_2 = arith.constant 0 : index
    %1 = vector.load %arg2[%c0_1, %c0_2] : memref<96x96xbf16, #tpu.memory_space<vmem>>, vector<96x96xbf16>
    %cst = arith.constant dense<0.000000e+00> : vector<16x96xf32>
    %2 = tpu.matmul %0, %1, %cst {dimension_numbers = #tpu.dot_dimension_numbers<[1], [0], [0], [1], [0, 0, 1, 1], [], []>} : vector<16x96xbf16>, vector<96x96xbf16>, vector<16x96xf32> -> vector<16x96xf32>
    %3 = vector.extract_strided_slice %2 {offsets = [0, 0], sizes = [8, 8], strides = [1, 1]} : vector<16x96xf32> to vector<8x8xf32>
    %4 = vector.extract_strided_slice %2 {offsets = [0, 32], sizes = [8, 8], strides = [1, 1]} : vector<16x96xf32> to vector<8x8xf32>
    %5 = vector.extract_strided_slice %2 {offsets = [0, 64], sizes = [8, 8], strides = [1, 1]} : vector<16x96xf32> to vector<8x8xf32>
    %cst_3 = arith.constant dense<0.000000e+00> : vector<8x8xf32>
    %6 = tpu.matmul %3, %4, %cst_3 {dimension_numbers = #tpu.dot_dimension_numbers<[1], [1], [0], [0], [0, 0, 1, 0], [], []>} : vector<8x8xf32>, vector<8x8xf32>, vector<8x8xf32> -> vector<8x8xf32>
    %cst_4 = arith.constant dense<0xFF800000> : vector<8xf32>
    %7 = vector.multi_reduction <maximumf>, %6, %cst_4 [1] : vector<8x8xf32> to vector<8xf32>
    %8 = vector.shape_cast %7 : vector<8xf32> to vector<8x1xf32>
    %9 = vector.broadcast %8 : vector<8x1xf32> to vector<8x8xf32>
    %10 = arith.subf %6, %9 : vector<8x8xf32>
    %11 = math.exp %10 : vector<8x8xf32>
    %cst_5 = arith.constant dense<0.000000e+00> : vector<8xf32>
    %12 = vector.multi_reduction <add>, %11, %cst_5 [1] : vector<8x8xf32> to vector<8xf32>
    %13 = vector.shape_cast %12 : vector<8xf32> to vector<8x1xf32>
    %14 = tpu.reciprocal %13 {approx = true} : vector<8x1xf32> -> vector<8x1xf32>
    %15 = vector.broadcast %14 : vector<8x1xf32> to vector<8x8xf32>
    %16 = arith.mulf %11, %15 : vector<8x8xf32>
    %cst_6 = arith.constant dense<0.000000e+00> : vector<8x8xf32>
    %17 = tpu.matmul %16, %5, %cst_6 {dimension_numbers = #tpu.dot_dimension_numbers<[1], [0], [0], [1], [0, 0, 1, 1], [], []>} : vector<8x8xf32>, vector<8x8xf32>, vector<8x8xf32> -> vector<8x8xf32>
    %18 = vector.extract_strided_slice %2 {offsets = [0, 8], sizes = [8, 8], strides = [1, 1]} : vector<16x96xf32> to vector<8x8xf32>
    %19 = vector.extract_strided_slice %2 {offsets = [0, 40], sizes = [8, 8], strides = [1, 1]} : vector<16x96xf32> to vector<8x8xf32>
    %20 = vector.extract_strided_slice %2 {offsets = [0, 72], sizes = [8, 8], strides = [1, 1]} : vector<16x96xf32> to vector<8x8xf32>
    %cst_7 = arith.constant dense<0.000000e+00> : vector<8x8xf32>
    %21 = tpu.matmul %18, %19, %cst_7 {dimension_numbers = #tpu.dot_dimension_numbers<[1], [1], [0], [0], [0, 0, 1, 0], [], []>} : vector<8x8xf32>, vector<8x8xf32>, vector<8x8xf32> -> vector<8x8xf32>
    %cst_8 = arith.constant dense<0xFF800000> : vector<8xf32>
    %22 = vector.multi_reduction <maximumf>, %21, %cst_8 [1] : vector<8x8xf32> to vector<8xf32>
    %23 = vector.shape_cast %22 : vector<8xf32> to vector<8x1xf32>
    %24 = vector.broadcast %23 : vector<8x1xf32> to vector<8x8xf32>
    %25 = arith.subf %21, %24 : vector<8x8xf32>
    %26 = math.exp %25 : vector<8x8xf32>
    %cst_9 = arith.constant dense<0.000000e+00> : vector<8xf32>
    %27 = vector.multi_reduction <add>, %26, %cst_9 [1] : vector<8x8xf32> to vector<8xf32>
    %28 = vector.shape_cast %27 : vector<8xf32> to vector<8x1xf32>
    %29 = tpu.reciprocal %28 {approx = true} : vector<8x1xf32> -> vector<8x1xf32>
    %30 = vector.broadcast %29 : vector<8x1xf32> to vector<8x8xf32>
    %31 = arith.mulf %26, %30 : vector<8x8xf32>
    %cst_10 = arith.constant dense<0.000000e+00> : vector<8x8xf32>
    %32 = tpu.matmul %31, %20, %cst_10 {dimension_numbers = #tpu.dot_dimension_numbers<[1], [0], [0], [1], [0, 0, 1, 1], [], []>} : vector<8x8xf32>, vector<8x8xf32>, vector<8x8xf32> -> vector<8x8xf32>
    %33 = vector.extract_strided_slice %2 {offsets = [0, 16], sizes = [8, 8], strides = [1, 1]} : vector<16x96xf32> to vector<8x8xf32>
    %34 = vector.extract_strided_slice %2 {offsets = [0, 48], sizes = [8, 8], strides = [1, 1]} : vector<16x96xf32> to vector<8x8xf32>
    %35 = vector.extract_strided_slice %2 {offsets = [0, 80], sizes = [8, 8], strides = [1, 1]} : vector<16x96xf32> to vector<8x8xf32>
    %cst_11 = arith.constant dense<0.000000e+00> : vector<8x8xf32>
    %36 = tpu.matmul %33, %34, %cst_11 {dimension_numbers = #tpu.dot_dimension_numbers<[1], [1], [0], [0], [0, 0, 1, 0], [], []>} : vector<8x8xf32>, vector<8x8xf32>, vector<8x8xf32> -> vector<8x8xf32>
    %cst_12 = arith.constant dense<0xFF800000> : vector<8xf32>
    %37 = vector.multi_reduction <maximumf>, %36, %cst_12 [1] : vector<8x8xf32> to vector<8xf32>
    %38 = vector.shape_cast %37 : vector<8xf32> to vector<8x1xf32>
    %39 = vector.broadcast %38 : vector<8x1xf32> to vector<8x8xf32>
    %40 = arith.subf %36, %39 : vector<8x8xf32>
    %41 = math.exp %40 : vector<8x8xf32>
    %cst_13 = arith.constant dense<0.000000e+00> : vector<8xf32>
    %42 = vector.multi_reduction <add>, %41, %cst_13 [1] : vector<8x8xf32> to vector<8xf32>
    %43 = vector.shape_cast %42 : vector<8xf32> to vector<8x1xf32>
    %44 = tpu.reciprocal %43 {approx = true} : vector<8x1xf32> -> vector<8x1xf32>
    %45 = vector.broadcast %44 : vector<8x1xf32> to vector<8x8xf32>
    %46 = arith.mulf %41, %45 : vector<8x8xf32>
    %cst_14 = arith.constant dense<0.000000e+00> : vector<8x8xf32>
    %47 = tpu.matmul %46, %35, %cst_14 {dimension_numbers = #tpu.dot_dimension_numbers<[1], [0], [0], [1], [0, 0, 1, 1], [], []>} : vector<8x8xf32>, vector<8x8xf32>, vector<8x8xf32> -> vector<8x8xf32>
    %48 = vector.extract_strided_slice %2 {offsets = [0, 24], sizes = [8, 8], strides = [1, 1]} : vector<16x96xf32> to vector<8x8xf32>
    %49 = vector.extract_strided_slice %2 {offsets = [0, 56], sizes = [8, 8], strides = [1, 1]} : vector<16x96xf32> to vector<8x8xf32>
    %50 = vector.extract_strided_slice %2 {offsets = [0, 88], sizes = [8, 8], strides = [1, 1]} : vector<16x96xf32> to vector<8x8xf32>
    %cst_15 = arith.constant dense<0.000000e+00> : vector<8x8xf32>
    %51 = tpu.matmul %48, %49, %cst_15 {dimension_numbers = #tpu.dot_dimension_numbers<[1], [1], [0], [0], [0, 0, 1, 0], [], []>} : vector<8x8xf32>, vector<8x8xf32>, vector<8x8xf32> -> vector<8x8xf32>
    %cst_16 = arith.constant dense<0xFF800000> : vector<8xf32>
    %52 = vector.multi_reduction <maximumf>, %51, %cst_16 [1] : vector<8x8xf32> to vector<8xf32>
    %53 = vector.shape_cast %52 : vector<8xf32> to vector<8x1xf32>
    %54 = vector.broadcast %53 : vector<8x1xf32> to vector<8x8xf32>
    %55 = arith.subf %51, %54 : vector<8x8xf32>
    %56 = math.exp %55 : vector<8x8xf32>
    %cst_17 = arith.constant dense<0.000000e+00> : vector<8xf32>
    %57 = vector.multi_reduction <add>, %56, %cst_17 [1] : vector<8x8xf32> to vector<8xf32>
    %58 = vector.shape_cast %57 : vector<8xf32> to vector<8x1xf32>
    %59 = tpu.reciprocal %58 {approx = true} : vector<8x1xf32> -> vector<8x1xf32>
    %60 = vector.broadcast %59 : vector<8x1xf32> to vector<8x8xf32>
    %61 = arith.mulf %56, %60 : vector<8x8xf32>
    %cst_18 = arith.constant dense<0.000000e+00> : vector<8x8xf32>
    %62 = tpu.matmul %61, %50, %cst_18 {dimension_numbers = #tpu.dot_dimension_numbers<[1], [0], [0], [1], [0, 0, 1, 1], [], []>} : vector<8x8xf32>, vector<8x8xf32>, vector<8x8xf32> -> vector<8x8xf32>
    %63 = tpu.concatenate %17, %32, %47, %62 in 1 : vector<8x8xf32>, vector<8x8xf32>, vector<8x8xf32>, vector<8x8xf32> -> vector<8x32xf32>
    %64 = vector.extract_strided_slice %2 {offsets = [8, 0], sizes = [8, 8], strides = [1, 1]} : vector<16x96xf32> to vector<8x8xf32>
    %65 = vector.extract_strided_slice %2 {offsets = [8, 32], sizes = [8, 8], strides = [1, 1]} : vector<16x96xf32> to vector<8x8xf32>
    %66 = vector.extract_strided_slice %2 {offsets = [8, 64], sizes = [8, 8], strides = [1, 1]} : vector<16x96xf32> to vector<8x8xf32>
    %cst_19 = arith.constant dense<0.000000e+00> : vector<8x8xf32>
    %67 = tpu.matmul %64, %65, %cst_19 {dimension_numbers = #tpu.dot_dimension_numbers<[1], [1], [0], [0], [0, 0, 1, 0], [], []>} : vector<8x8xf32>, vector<8x8xf32>, vector<8x8xf32> -> vector<8x8xf32>
    %cst_20 = arith.constant dense<0xFF800000> : vector<8xf32>
    %68 = vector.multi_reduction <maximumf>, %67, %cst_20 [1] : vector<8x8xf32> to vector<8xf32>
    %69 = vector.shape_cast %68 : vector<8xf32> to vector<8x1xf32>
    %70 = vector.broadcast %69 : vector<8x1xf32> to vector<8x8xf32>
    %71 = arith.subf %67, %70 : vector<8x8xf32>
    %72 = math.exp %71 : vector<8x8xf32>
    %cst_21 = arith.constant dense<0.000000e+00> : vector<8xf32>
    %73 = vector.multi_reduction <add>, %72, %cst_21 [1] : vector<8x8xf32> to vector<8xf32>
    %74 = vector.shape_cast %73 : vector<8xf32> to vector<8x1xf32>
    %75 = tpu.reciprocal %74 {approx = true} : vector<8x1xf32> -> vector<8x1xf32>
    %76 = vector.broadcast %75 : vector<8x1xf32> to vector<8x8xf32>
    %77 = arith.mulf %72, %76 : vector<8x8xf32>
    %cst_22 = arith.constant dense<0.000000e+00> : vector<8x8xf32>
    %78 = tpu.matmul %77, %66, %cst_22 {dimension_numbers = #tpu.dot_dimension_numbers<[1], [0], [0], [1], [0, 0, 1, 1], [], []>} : vector<8x8xf32>, vector<8x8xf32>, vector<8x8xf32> -> vector<8x8xf32>
    %79 = vector.extract_strided_slice %2 {offsets = [8, 8], sizes = [8, 8], strides = [1, 1]} : vector<16x96xf32> to vector<8x8xf32>
    %80 = vector.extract_strided_slice %2 {offsets = [8, 40], sizes = [8, 8], strides = [1, 1]} : vector<16x96xf32> to vector<8x8xf32>
    %81 = vector.extract_strided_slice %2 {offsets = [8, 72], sizes = [8, 8], strides = [1, 1]} : vector<16x96xf32> to vector<8x8xf32>
    %cst_23 = arith.constant dense<0.000000e+00> : vector<8x8xf32>
    %82 = tpu.matmul %79, %80, %cst_23 {dimension_numbers = #tpu.dot_dimension_numbers<[1], [1], [0], [0], [0, 0, 1, 0], [], []>} : vector<8x8xf32>, vector<8x8xf32>, vector<8x8xf32> -> vector<8x8xf32>
    %cst_24 = arith.constant dense<0xFF800000> : vector<8xf32>
    %83 = vector.multi_reduction <maximumf>, %82, %cst_24 [1] : vector<8x8xf32> to vector<8xf32>
    %84 = vector.shape_cast %83 : vector<8xf32> to vector<8x1xf32>
    %85 = vector.broadcast %84 : vector<8x1xf32> to vector<8x8xf32>
    %86 = arith.subf %82, %85 : vector<8x8xf32>
    %87 = math.exp %86 : vector<8x8xf32>
    %cst_25 = arith.constant dense<0.000000e+00> : vector<8xf32>
    %88 = vector.multi_reduction <add>, %87, %cst_25 [1] : vector<8x8xf32> to vector<8xf32>
    %89 = vector.shape_cast %88 : vector<8xf32> to vector<8x1xf32>
    %90 = tpu.reciprocal %89 {approx = true} : vector<8x1xf32> -> vector<8x1xf32>
    %91 = vector.broadcast %90 : vector<8x1xf32> to vector<8x8xf32>
    %92 = arith.mulf %87, %91 : vector<8x8xf32>
    %cst_26 = arith.constant dense<0.000000e+00> : vector<8x8xf32>
    %93 = tpu.matmul %92, %81, %cst_26 {dimension_numbers = #tpu.dot_dimension_numbers<[1], [0], [0], [1], [0, 0, 1, 1], [], []>} : vector<8x8xf32>, vector<8x8xf32>, vector<8x8xf32> -> vector<8x8xf32>
    %94 = vector.extract_strided_slice %2 {offsets = [8, 16], sizes = [8, 8], strides = [1, 1]} : vector<16x96xf32> to vector<8x8xf32>
    %95 = vector.extract_strided_slice %2 {offsets = [8, 48], sizes = [8, 8], strides = [1, 1]} : vector<16x96xf32> to vector<8x8xf32>
    %96 = vector.extract_strided_slice %2 {offsets = [8, 80], sizes = [8, 8], strides = [1, 1]} : vector<16x96xf32> to vector<8x8xf32>
    %cst_27 = arith.constant dense<0.000000e+00> : vector<8x8xf32>
    %97 = tpu.matmul %94, %95, %cst_27 {dimension_numbers = #tpu.dot_dimension_numbers<[1], [1], [0], [0], [0, 0, 1, 0], [], []>} : vector<8x8xf32>, vector<8x8xf32>, vector<8x8xf32> -> vector<8x8xf32>
    %cst_28 = arith.constant dense<0xFF800000> : vector<8xf32>
    %98 = vector.multi_reduction <maximumf>, %97, %cst_28 [1] : vector<8x8xf32> to vector<8xf32>
    %99 = vector.shape_cast %98 : vector<8xf32> to vector<8x1xf32>
    %100 = vector.broadcast %99 : vector<8x1xf32> to vector<8x8xf32>
    %101 = arith.subf %97, %100 : vector<8x8xf32>
    %102 = math.exp %101 : vector<8x8xf32>
    %cst_29 = arith.constant dense<0.000000e+00> : vector<8xf32>
    %103 = vector.multi_reduction <add>, %102, %cst_29 [1] : vector<8x8xf32> to vector<8xf32>
    %104 = vector.shape_cast %103 : vector<8xf32> to vector<8x1xf32>
    %105 = tpu.reciprocal %104 {approx = true} : vector<8x1xf32> -> vector<8x1xf32>
    %106 = vector.broadcast %105 : vector<8x1xf32> to vector<8x8xf32>
    %107 = arith.mulf %102, %106 : vector<8x8xf32>
    %cst_30 = arith.constant dense<0.000000e+00> : vector<8x8xf32>
    %108 = tpu.matmul %107, %96, %cst_30 {dimension_numbers = #tpu.dot_dimension_numbers<[1], [0], [0], [1], [0, 0, 1, 1], [], []>} : vector<8x8xf32>, vector<8x8xf32>, vector<8x8xf32> -> vector<8x8xf32>
    %109 = vector.extract_strided_slice %2 {offsets = [8, 24], sizes = [8, 8], strides = [1, 1]} : vector<16x96xf32> to vector<8x8xf32>
    %110 = vector.extract_strided_slice %2 {offsets = [8, 56], sizes = [8, 8], strides = [1, 1]} : vector<16x96xf32> to vector<8x8xf32>
    %111 = vector.extract_strided_slice %2 {offsets = [8, 88], sizes = [8, 8], strides = [1, 1]} : vector<16x96xf32> to vector<8x8xf32>
    %cst_31 = arith.constant dense<0.000000e+00> : vector<8x8xf32>
    %112 = tpu.matmul %109, %110, %cst_31 {dimension_numbers = #tpu.dot_dimension_numbers<[1], [1], [0], [0], [0, 0, 1, 0], [], []>} : vector<8x8xf32>, vector<8x8xf32>, vector<8x8xf32> -> vector<8x8xf32>
    %cst_32 = arith.constant dense<0xFF800000> : vector<8xf32>
    %113 = vector.multi_reduction <maximumf>, %112, %cst_32 [1] : vector<8x8xf32> to vector<8xf32>
    %114 = vector.shape_cast %113 : vector<8xf32> to vector<8x1xf32>
    %115 = vector.broadcast %114 : vector<8x1xf32> to vector<8x8xf32>
    %116 = arith.subf %112, %115 : vector<8x8xf32>
    %117 = math.exp %116 : vector<8x8xf32>
    %cst_33 = arith.constant dense<0.000000e+00> : vector<8xf32>
    %118 = vector.multi_reduction <add>, %117, %cst_33 [1] : vector<8x8xf32> to vector<8xf32>
    %119 = vector.shape_cast %118 : vector<8xf32> to vector<8x1xf32>
    %120 = tpu.reciprocal %119 {approx = true} : vector<8x1xf32> -> vector<8x1xf32>
    %121 = vector.broadcast %120 : vector<8x1xf32> to vector<8x8xf32>
    %122 = arith.mulf %117, %121 : vector<8x8xf32>
    %cst_34 = arith.constant dense<0.000000e+00> : vector<8x8xf32>
    %123 = tpu.matmul %122, %111, %cst_34 {dimension_numbers = #tpu.dot_dimension_numbers<[1], [0], [0], [1], [0, 0, 1, 1], [], []>} : vector<8x8xf32>, vector<8x8xf32>, vector<8x8xf32> -> vector<8x8xf32>
    %124 = tpu.concatenate %78, %93, %108, %123 in 1 : vector<8x8xf32>, vector<8x8xf32>, vector<8x8xf32>, vector<8x8xf32> -> vector<8x32xf32>
    %125 = tpu.concatenate %63, %124 in 0 : vector<8x32xf32>, vector<8x32xf32> -> vector<16x32xf32>
    %c0_35 = arith.constant 0 : index
    %c0_36 = arith.constant 0 : index
    %126 = vector.load %arg3[%c0_35, %c0_36] : memref<32x32xf32, #tpu.memory_space<vmem>>, vector<32x32xf32>
    %cst_37 = arith.constant dense<0.000000e+00> : vector<16x32xf32>
    %127 = tpu.matmul %125, %126, %cst_37 {dimension_numbers = #tpu.dot_dimension_numbers<[1], [0], [0], [1], [0, 0, 1, 1], [], []>} : vector<16x32xf32>, vector<32x32xf32>, vector<16x32xf32> -> vector<16x32xf32>
    %c0_38 = arith.constant 0 : index
    %c0_39 = arith.constant 0 : index
    %128 = vector.load %arg4[%c0_38, %c0_39] : memref<1x32xf32, #tpu.memory_space<vmem>>, vector<1x32xf32>
    %129 = vector.broadcast %128 : vector<1x32xf32> to vector<16x32xf32>
    %130 = arith.addf %127, %129 : vector<16x32xf32>
    %c0_40 = arith.constant 0 : index
    %c0_41 = arith.constant 0 : index
    %131 = vector.load %arg5[%c0_40, %c0_41] : memref<16x32xf32, #tpu.memory_space<vmem>>, vector<16x32xf32>
    tpu.vector_store %arg5[%c0_40, %c0_41], %130 {strides = array<i32>} : memref<16x32xf32, #tpu.memory_space<vmem>>, vector<16x32xf32>,
    return
  }
  func.func @transform_0(%arg0: i32) -> (i32, i32) {
    %c0_i32 = arith.constant 0 : i32
    %c0_i32_0 = arith.constant 0 : i32
    return %arg0, %c0_i32 : i32, i32
  }
  func.func @transform_1(%arg0: i32) -> (i32, i32) {
    %c0_i32 = arith.constant 0 : i32
    %c0_i32_0 = arith.constant 0 : i32
    %c0_i32_1 = arith.constant 0 : i32
    return %c0_i32, %c0_i32_0 : i32, i32
  }
  func.func @transform_2(%arg0: i32) -> (i32, i32) {
    %c0_i32 = arith.constant 0 : i32
    %c0_i32_0 = arith.constant 0 : i32
    %c0_i32_1 = arith.constant 0 : i32
    return %c0_i32, %c0_i32_0 : i32, i32
  }
  func.func @transform_3(%arg0: i32) -> (i32, i32) {
    %c0_i32 = arith.constant 0 : i32
    %c0_i32_0 = arith.constant 0 : i32
    %c0_i32_1 = arith.constant 0 : i32
    return %c0_i32, %c0_i32_0 : i32, i32
  }
  func.func @transform_4(%arg0: i32) -> (i32, i32) {
    %c0_i32 = arith.constant 0 : i32
    %c0_i32_0 = arith.constant 0 : i32
    return %arg0, %c0_i32 : i32, i32
  }
}

</mosaic_0001>

<bundles_post_ra>
// kernel: mps_attention_forward.1
= control target key start
LH: loop header
LB: loop body
LE: loop exit
PB: predicated region body
PF: predicated region fallthrough
CT: control target
= control target key end

     0   :  { %v1857_v1 = vmov 0.0   ;;  %vm1858_vm0 = vmmov 0   ;;  %s2108_s0 = inlined_call_operand.vmem [shape: bf16[16,96], index: 0, kind: input, shape index: {}]   ;;  %s2109_s1 = inlined_call_operand.vmem [shape: bf16[96,96], index: 1, kind: input, shape index: {}]   ;;  %s2110_s2 = inlined_call_operand.vmem [shape: f32[32,32], index: 2, kind: input, shape index: {}]   ;;  %s2111_s3 = inlined_call_operand.vmem [shape: f32[1,32], index: 3, kind: input, shape index: {}]   ;;  %s2112_s4 = inlined_call_operand.hbm [shape: f32[16,32], index: 4, kind: output, shape index: {}]  }
   0x1   :  { %v1794_v0 = vld [vmem:[%s2109_s1] sm:$0xff]   ;;  %1661 = vmatprep.subr.bf16.mxu0 %v1857_v1  ;;  %1677 = vmatprep.subr.mxu1 %v1857_v1  ;;  %v1795_v2 = vld [vmem:[%s2109_s1 + $0x8] sm:$0xff]   ;;  %v1796_v3 = vld [vmem:[%s2109_s1 + $0x10] sm:$0xff]  }
   0x2   :  { %1662 = vmatpush3.bf16.msra.mxu0 %v1794_v0  ;;  %1673 = vmatprep.mubr.msk.bf16.mxu0 %vm1858_vm0, %v1857_v1 }
   0x3   :  { %1663 = vmatprep.subr.bf16.mxu0 %v1857_v1  ;;  %1679 = vmatprep.mubr.msk.f32.mxu1 %vm1858_vm0, %v1857_v1 }
   0x6   :  { %1664 = vmatpush3.bf16.msra.mxu0 %v1795_v2 }
   0x7   :  { %1665 = vmatprep.subr.bf16.mxu0 %v1857_v1 }
   0x8   :  { %9 = vsyncpa [#allocation3], 0  ;;  %v1797_v4 = vld [vmem:[%s2109_s1 + $0x18] sm:$0xff]   ;;  %v1798_v5 = vld [vmem:[%s2109_s1 + $0x20] sm:$0xff]   ;;  %vm74_vm1 = vcmask 785408   ;;  %s1859_s29 = smov 64  }
   0x9   :  { %v1799_v6 = vld [vmem:[%s2109_s1 + $0x28] sm:$0xff]   ;;  %v1800_v7 = vld [vmem:[%s2108_s0] sm:$0xff]   ;;  %s1860_s1 = smov 96   ;;  %s1861_s0 = smov 88   ;;  %vm122_vm2 = vcmask 64512   ;;  %vm792_vm3 = vcmask 130048  }
   0xa   :  { %1666 = vmatpush3.bf16.msra.mxu0 %v1796_v3  ;;  %s1862_s30 = smov 56   ;;  %s1863_s5 = smov 80   ;;  %vm794_vm4 = vcmask 195584   ;;  %vm1481_vm5 = vcmask 261120  }
   0xb   :  { %1667 = vmatprep.subr.bf16.mxu0 %v1857_v1  ;;  %s1864_s6 = smov 120   ;;  %s1865_s7 = smov 112  }
   0xc   :  { %s1866_s8 = smov 48   ;;  %s1867_s9 = smov 72  }
   0xd   :  { %s1868_s10 = smov 104   ;;  %s1869_s11 = smov 40  }
   0xe   :  { %1668 = vmatpush3.bf16.msra.mxu0 %v1797_v4  ;;  %s1870_s12 = smov 16   ;;  %s1871_s13 = smov 8  }
   0xf   :  { %1669 = vmatprep.subr.bf16.mxu0 %v1857_v1  ;;  %s1872_s22 = smov 24   ;;  %s1873_s24 = smov [#allocation2]  }
  0x10   :  { %s1570_s25 = sshll.u32 %s1873_s24, 4  ;;  %s1571_s25 = int_to_ptr.vmem [resolvable:$true] %s1570_s25 }
  0x11   :  { %s1833_s26 = scalar_lea.vmem %s1571_s25, 256  ;;  %p1838_p1 = scmp.lt.s32.totalorder %s1571_s25, %s1571_s25 }
  0x12   :  { %1670 = vmatpush3.bf16.msra.mxu0 %v1798_v5  ;;  %p1834_p0 = scmp.ne.s32.totalorder %s1571_s25, %s1833_s26  ;;  %p1839_p2 = scmp.lt.s32.totalorder %s1833_s26, %s1833_s26 }
  0x13   :  { %1671 = vmatprep.subr.bf16.mxu0 %v1857_v1 }
  0x14   :  { %p1840_p3 = por %p1839_p2, %p1838_p1 }
  0x16   :  { %1672 = vmatpush3.bf16.msra.mxu0 %v1799_v6  ;;  %p1841_p4 = pnand %p1840_p3, %p1834_p0 }
  0x17   :  { %1712 = vmatprep.subr.mxu0 %v1857_v1 }
  0x19   :  { %1674 = vmatmul.mubr.msk.bf16.vlgmr.msra.gmra.mrb[0].mxu0 %vm74_vm1, %v1800_v7 }
  0x1a   :  { %1714 = vmatprep.mubr.msk.f32.mxu0 %vm1858_vm0, %v1857_v1 }
  0xec   :  { %v1935_v8 = vpop.f32.mrb[0].mxu0 }
  0xed   :  { %208 = vrot.lane.b32.xlu1 %v1935_v8, %s1859_s29  ;;  %120 = vrot.lane.b32.xlu0 %v1935_v8, %s1860_s1  ;;  %v1675_v9 = vpop.f32.mrb[1].mxu0 }
  0xee   :  { %v1941_v10 = vpop.f32.mrb[2].mxu0 }
  0xef   :  { %v1676_v11 = vpop.f32.mrb[3].mxu0 }
  0xf1   :  { %286 = vrot.lane.b32.xlu1 %v1935_v8, %s1861_s0 }
 0x15f   :  { %v121_v12 = vpop.permute.xlu0 %120  ;;  %v209_v13 = vpop.permute.xlu1 %208 }
 0x160   :  { %1678 = vmatpush3.xpose.msk.msra.mxu1 %vm122_vm2, %v121_v12 }
 0x161   :  { %1682 = vmatprep.subr.mxu1 %v1857_v1 }
 0x163   :  { %1680 = vmatmul.mubr.msk.f32.vlgmr.msra.gmra.mrb[0].mxu1 %vm122_vm2, %v1935_v8  ;;  %v287_v22 = vpop.permute.xlu1 %286 }
 0x164   :  { %1683 = vmatpush3.msra.mxu1 %v209_v13  ;;  %1684 = vmatprep.mubr.msk.f32.mxu1 %vm1858_vm0, %v1857_v1 }
 0x165   :  { %1687 = vmatprep.subr.mxu1 %v1857_v1 }
 0x236   :  { %v193_v14 = vpop.f32.mrb[0].mxu1 }
 0x237   :  { %v1681_v15 = vpop.f32.mrb[1].mxu1  ;;  %v197_v16 = vsel %vm122_vm2, %v193_v14, -inf }
 0x238   :  { %198 = vmax.xlane.f32.xlu0 %v197_v16 }
 0x24e   :  { %373 = vrot.lane.b32.xlu0 %v1935_v8, %s1862_s30 }
 0x252   :  { %451 = vrot.lane.b32.xlu0 %v1935_v8, %s1863_s5 }
 0x2c5   :  { %v199_v17 = vpop.xlane.xlu0 %198 }
 0x2c6   :  { %v200_v18 = vsub.f32 %v193_v14, %v199_v17 }
 0x2c8   :  { %v201_v19 = vmul.f32 1.442695, %v200_v18 }
 0x2c9   :  { %v374_v27 = vpop.permute.xlu0 %373 }
 0x2ca   :  { %1801 = vpow2.f32 %v201_v19 }
 0x2cd   :  { %v452_v38 = vpop.permute.xlu0 %451 }
 0x2d4   :  { %v1802_v20 = vpop.eup %1801 }
 0x2d5   :  { %v203_v21 = vsel %vm122_vm2, %v1802_v20, 0.0 }
 0x2d6   :  { %204 = vadd.xlane.f32.xlu1 %v203_v21 }
 0x2e7   :  { %284 = vrot.lane.b32.xlu1 %v1935_v8, %s1864_s6 }
 0x363   :  { %v205_v23 = vpop.xlane.xlu1 %204 }
 0x364   :  { %1803 = vrcp.f32 %v205_v23 }
 0x367   :  { %v285_v26 = vpop.permute.xlu1 %284 }
 0x36e   :  { %v1804_v24 = vpop.eup %1803 }
 0x36f   :  { %v207_v25 = vmul.f32 %v1804_v24, %v1802_v20 }
 0x371   :  { %1685 = vmatmul.mubr.msk.f32.vlgmr.msra.gmra.mrb[2].mxu1 %vm122_vm2, %v207_v25 }
 0x372   :  { %1688 = vmatpush3.xpose.msk.msra.mxu1 %vm122_vm2, %v287_v22  ;;  %1689 = vmatprep.mubr.msk.f32.mxu1 %vm1858_vm0, %v1857_v1 }
 0x373   :  { %1692 = vmatprep.subr.mxu1 %v1857_v1 }
 0x375   :  { %1690 = vmatmul.mubr.msk.f32.vlgmr.msra.gmra.mrb[4].mxu1 %vm122_vm2, %v285_v26 }
 0x376   :  { %1693 = vmatpush3.msra.mxu1 %v374_v27  ;;  %1694 = vmatprep.mubr.msk.f32.mxu1 %vm1858_vm0, %v1857_v1 }
 0x377   :  { %1697 = vmatprep.subr.mxu1 %v1857_v1 }
 0x444   :  { %v1969_v28 = vpop.f32.mrb[2].mxu1 }
 0x445   :  { %v1686_v29 = vpop.f32.mrb[3].mxu1 }
 0x448   :  { %v358_v30 = vpop.f32.mrb[4].mxu1 }
 0x449   :  { %v1691_v31 = vpop.f32.mrb[5].mxu1  ;;  %v362_v32 = vsel %vm122_vm2, %v358_v30, -inf }
 0x44a   :  { %363 = vmax.xlane.f32.xlu1 %v362_v32 }
 0x4d7   :  { %v364_v33 = vpop.xlane.xlu1 %363 }
 0x4d8   :  { %v365_v34 = vsub.f32 %v358_v30, %v364_v33 }
 0x4da   :  { %v366_v35 = vmul.f32 1.442695, %v365_v34 }
 0x4dc   :  { %1805 = vpow2.f32 %v366_v35 }
 0x4e6   :  { %v1806_v36 = vpop.eup %1805 }
 0x4e7   :  { %v368_v37 = vsel %vm122_vm2, %v1806_v36, 0.0 }
 0x4e8   :  { %369 = vadd.xlane.f32.xlu0 %v368_v37 }
 0x4fe   :  { %449 = vrot.lane.b32.xlu0 %v1935_v8, %s1865_s7 }
 0x575   :  { %v370_v39 = vpop.xlane.xlu0 %369 }
 0x576   :  { %1807 = vrcp.f32 %v370_v39 }
 0x579   :  { %v450_v42 = vpop.permute.xlu0 %449 }
 0x580   :  { %v1808_v40 = vpop.eup %1807 }
 0x581   :  { %v372_v41 = vmul.f32 %v1808_v40, %v1806_v36 }
 0x583   :  { %1695 = vmatmul.mubr.msk.f32.vlgmr.msra.gmra.mrb[6].mxu1 %vm122_vm2, %v372_v41 }
 0x584   :  { %1698 = vmatpush3.xpose.msk.msra.mxu1 %vm122_vm2, %v452_v38  ;;  %1699 = vmatprep.mubr.msk.f32.mxu1 %vm1858_vm0, %v1857_v1 }
 0x585   :  { %1702 = vmatprep.subr.mxu1 %v1857_v1 }
 0x587   :  { %1700 = vmatmul.mubr.msk.f32.vlgmr.msra.gmra.mrb[8].mxu1 %vm122_vm2, %v450_v42 }
 0x588   :  { %1704 = vmatprep.mubr.msk.f32.mxu1 %vm1858_vm0, %v1857_v1 }
 0x656   :  { %v1982_v43 = vpop.f32.mrb[6].mxu1 }
 0x657   :  { %v1696_v44 = vpop.f32.mrb[7].mxu1 }
 0x65a   :  { %v523_v45 = vpop.f32.mrb[8].mxu1 }
 0x65b   :  { %v1701_v46 = vpop.f32.mrb[9].mxu1  ;;  %v527_v47 = vsel %vm122_vm2, %v523_v45, -inf }
 0x65c   :  { %528 = vmax.xlane.f32.xlu1 %v527_v47 }
 0x66d   :  { %538 = vrot.lane.b32.xlu1 %v1935_v8, %s1866_s8 }
 0x671   :  { %616 = vrot.lane.b32.xlu1 %v1935_v8, %s1867_s9 }
 0x675   :  { %614 = vrot.lane.b32.xlu1 %v1935_v8, %s1868_s10 }
 0x679   :  { %797 = vrot.lane.b32.xlu1 %v1941_v10, %s1860_s1 }
 0x67d   :  { %962 = vrot.lane.b32.xlu1 %v1941_v10, %s1861_s0 }
 0x681   :  { %1127 = vrot.lane.b32.xlu1 %v1941_v10, %s1863_s5 }
 0x685   :  { %1125 = vrot.lane.b32.xlu1 %v1941_v10, %s1865_s7 }
 0x689   :  { %1292 = vrot.lane.b32.xlu1 %v1941_v10, %s1867_s9 }
 0x68d   :  { %1290 = vrot.lane.b32.xlu1 %v1941_v10, %s1868_s10 }
 0x6e9   :  { %v529_v48 = vpop.xlane.xlu1 %528 }
 0x6ea   :  { %v530_v49 = vsub.f32 %v523_v45, %v529_v48 }
 0x6ec   :  { %v531_v50 = vmul.f32 1.442695, %v530_v49 }
 0x6ed   :  { %v539_v51 = vpop.permute.xlu1 %538 }
 0x6ee   :  { %1809 = vpow2.f32 %v531_v50  ;;  %1703 = vmatpush3.msra.mxu1 %v539_v51 }
 0x6ef   :  { %1707 = vmatprep.subr.mxu1 %v1857_v1 }
 0x6f1   :  { %v617_v54 = vpop.permute.xlu1 %616 }
 0x6f5   :  { %v615_v55 = vpop.permute.xlu1 %614 }
 0x6f8   :  { %v1810_v52 = vpop.eup %1809 }
 0x6f9   :  { %v533_v53 = vsel %vm122_vm2, %v1810_v52, 0.0  ;;  %v798_v57 = vpop.permute.xlu1 %797 }
 0x6fa   :  { %534 = vadd.xlane.f32.xlu0 %v533_v53 }
 0x6fd   :  { %v963_v58 = vpop.permute.xlu1 %962 }
 0x701   :  { %v1128_v61 = vpop.permute.xlu1 %1127 }
 0x705   :  { %v1126_v62 = vpop.permute.xlu1 %1125 }
 0x709   :  { %v1293_v0 = vpop.permute.xlu1 %1292 }
 0x70d   :  { %v1291_v2 = vpop.permute.xlu1 %1290 }
 0x710   :  { %960 = vrot.lane.b32.xlu0 %v1941_v10, %s1864_s6 }
 0x787   :  { %v535_v56 = vpop.xlane.xlu0 %534 }
 0x788   :  { %1811 = vrcp.f32 %v535_v56 }
 0x78b   :  { %v961_v63 = vpop.permute.xlu0 %960 }
 0x792   :  { %v1812_v59 = vpop.eup %1811 }
 0x793   :  { %v537_v60 = vmul.f32 %v1812_v59, %v1810_v52 }
 0x795   :  { %1705 = vmatmul.mubr.msk.f32.vlgmr.msra.gmra.mrb[10].mxu1 %vm122_vm2, %v537_v60 }
 0x796   :  { %1708 = vmatpush3.xpose.msk.msra.mxu1 %vm122_vm2, %v617_v54  ;;  %1709 = vmatprep.mubr.msk.f32.mxu1 %vm1858_vm0, %v1857_v1 }
 0x797   :  { %1717 = vmatprep.subr.mxu1 %v1857_v1 }
 0x799   :  { %1710 = vmatmul.mubr.msk.f32.vlgmr.msra.gmra.mrb[12].mxu1 %vm122_vm2, %v615_v55 }
 0x79a   :  { %1718 = vmatpush3.xpose.msk.msra.mxu1 %vm122_vm2, %v798_v57  ;;  %1719 = vmatprep.mubr.msk.f32.mxu1 %vm1858_vm0, %v1857_v1 }
 0x79b   :  { %1727 = vmatprep.subr.mxu1 %v1857_v1 }
 0x79d   :  { %1720 = vmatmul.mubr.msk.f32.vlgmr.msra.gmra.mrb[14].mxu1 %vm122_vm2, %v1941_v10 }
 0x79e   :  { %1728 = vmatpush3.xpose.msk.msra.mxu1 %vm122_vm2, %v963_v58  ;;  %1729 = vmatprep.mubr.msk.f32.mxu1 %vm1858_vm0, %v1857_v1 }
 0x79f   :  { %1737 = vmatprep.subr.mxu1 %v1857_v1 }
 0x7a1   :  { %1730 = vmatmul.mubr.msk.f32.vlgmr.msra.gmra.mrb[16].mxu1 %vm122_vm2, %v961_v63 }
 0x7a2   :  { %1738 = vmatpush3.xpose.msk.msra.mxu1 %vm122_vm2, %v1128_v61  ;;  %1739 = vmatprep.mubr.msk.f32.mxu1 %vm1858_vm0, %v1857_v1 }
 0x7a3   :  { %1747 = vmatprep.subr.mxu1 %v1857_v1 }
 0x7a5   :  { %1740 = vmatmul.mubr.msk.f32.vlgmr.msra.gmra.mrb[18].mxu1 %vm122_vm2, %v1126_v62 }
 0x7a6   :  { %1748 = vmatpush3.xpose.msk.msra.mxu1 %vm122_vm2, %v1293_v0  ;;  %1749 = vmatprep.mubr.msk.f32.mxu1 %vm1858_vm0, %v1857_v1 }
 0x7a9   :  { %1750 = vmatmul.mubr.msk.f32.vlgmr.msra.gmra.mrb[20].mxu1 %vm122_vm2, %v1291_v2 }
 0x868   :  { %v2028_v3 = vpop.f32.mrb[10].mxu1 }
 0x869   :  { %v1706_v4 = vpop.f32.mrb[11].mxu1 }
 0x86a   :  { %v1471_v4 = vld [vmem:[%s2110_s2 + $0x8] sm:$0xff] }
 0x86c   :  { %v688_v5 = vpop.f32.mrb[12].mxu1 }
 0x86d   :  { %v1711_v6 = vpop.f32.mrb[13].mxu1  ;;  %v692_v7 = vsel %vm122_vm2, %v688_v5, -inf }
 0x86e   :  { %693 = vmax.xlane.f32.xlu1 %v692_v7  ;;  %v1472_v6 = vld [vmem:[%s2110_s2 + $0x10] sm:$0xff] }
 0x870   :  { %v869_v9 = vpop.f32.mrb[14].mxu1 }
 0x871   :  { %v1721_v11 = vpop.f32.mrb[15].mxu1  ;;  %v873_v12 = vsel %vm122_vm2, %v869_v9, -inf }
 0x872   :  { %874 = vmax.xlane.f32.xlu0 %v873_v12 }
 0x874   :  { %v1034_v13 = vpop.f32.mrb[16].mxu1 }
 0x875   :  { %v1731_v14 = vpop.f32.mrb[17].mxu1  ;;  %v1038_v15 = vsel %vm122_vm2, %v1034_v13, -inf }
 0x876   :  { %1039 = vmax.xlane.f32.xlu0 %v1038_v15 }
 0x878   :  { %v1199_v16 = vpop.f32.mrb[18].mxu1 }
 0x879   :  { %v1741_v17 = vpop.f32.mrb[19].mxu1  ;;  %v1203_v18 = vsel %vm122_vm2, %v1199_v16, -inf }
 0x87a   :  { %1204 = vmax.xlane.f32.xlu1 %v1203_v18 }
 0x87c   :  { %v1364_v19 = vpop.f32.mrb[20].mxu1 }
 0x87d   :  { %v1751_v20 = vpop.f32.mrb[21].mxu1  ;;  %v1368_v21 = vsel %vm122_vm2, %v1364_v19, -inf }
 0x87e   :  { %1369 = vmax.xlane.f32.xlu0 %v1368_v21 }
 0x88b   :  { %884 = vrot.lane.b32.xlu1 %v1941_v10, %s1859_s29 }
 0x88f   :  { %1049 = vrot.lane.b32.xlu1 %v1941_v10, %s1862_s30 }
 0x894   :  { %703 = vrot.lane.b32.xlu0 %v1935_v8, %s1869_s11 }
 0x8fb   :  { %v694_v22 = vpop.xlane.xlu1 %693 }
 0x8fc   :  { %v695_v23 = vsub.f32 %v688_v5, %v694_v22 }
 0x8fe   :  { %v696_v24 = vmul.f32 1.442695, %v695_v23 }
 0x8ff   :  { %v875_v25 = vpop.xlane.xlu0 %874 }
 0x900   :  { %1813 = vpow2.f32 %v696_v24  ;;  %v876_v26 = vsub.f32 %v869_v9, %v875_v25 }
 0x902   :  { %v877_v27 = vmul.f32 1.442695, %v876_v26 }
 0x903   :  { %v1040_v29 = vpop.xlane.xlu0 %1039 }
 0x904   :  { %1815 = vpow2.f32 %v877_v27  ;;  %v1041_v30 = vsub.f32 %v1034_v13, %v1040_v29 }
 0x906   :  { %v1042_v31 = vmul.f32 1.442695, %v1041_v30 }
 0x907   :  { %v1205_v32 = vpop.xlane.xlu1 %1204 }
 0x908   :  { %1817 = vpow2.f32 %v1042_v31  ;;  %v1206_v33 = vsub.f32 %v1199_v16, %v1205_v32 }
 0x90a   :  { %v1814_v34 = vpop.eup %1813  ;;  %v1207_v35 = vmul.f32 1.442695, %v1206_v33  ;;  %v1613_v33 = vld [vmem:[%s2111_s3] ss:$0 sm:$0xff] }
 0x90b   :  { %v1370_v36 = vpop.xlane.xlu0 %1369  ;;  %v698_v37 = vsel %vm122_vm2, %v1814_v34, 0.0  ;;  %v885_v49 = vpop.permute.xlu1 %884 }
 0x90c   :  { %1819 = vpow2.f32 %v1207_v35  ;;  %v1371_v8 = vsub.f32 %v1364_v19, %v1370_v36  ;;  %699 = vadd.xlane.f32.xlu1 %v698_v37 }
 0x90e   :  { %v1816_v38 = vpop.eup %1815  ;;  %v1372_v39 = vmul.f32 1.442695, %v1371_v8 }
 0x90f   :  { %v704_v40 = vpop.permute.xlu0 %703  ;;  %v879_v41 = vsel %vm122_vm2, %v1816_v38, 0.0  ;;  %v1050_v50 = vpop.permute.xlu1 %1049 }
 0x910   :  { %1821 = vpow2.f32 %v1372_v39  ;;  %880 = vadd.xlane.f32.xlu0 %v879_v41  ;;  %1713 = vmatpush3.msra.mxu0 %v704_v40 }
 0x911   :  { %1722 = vmatprep.subr.mxu0 %v1857_v1 }
 0x912   :  { %v1818_v42 = vpop.eup %1817 }
 0x913   :  { %v1044_v44 = vsel %vm122_vm2, %v1818_v42, 0.0 }
 0x914   :  { %1045 = vadd.xlane.f32.xlu1 %v1044_v44 }
 0x916   :  { %v1820_v45 = vpop.eup %1819 }
 0x917   :  { %v1209_v46 = vsel %vm122_vm2, %v1820_v45, 0.0 }
 0x918   :  { %1210 = vadd.xlane.f32.xlu0 %v1209_v46 }
 0x91a   :  { %v1822_v47 = vpop.eup %1821 }
 0x91b   :  { %v1374_v48 = vsel %vm122_vm2, %v1822_v47, 0.0 }
 0x91c   :  { %1375 = vadd.xlane.f32.xlu1 %v1374_v48 }
 0x92d   :  { %1379 = vrot.lane.b32.xlu1 %v1941_v10, %s1869_s11 }
 0x92e   :  { %1214 = vrot.lane.b32.xlu0 %v1941_v10, %s1866_s8 }
 0x931   :  { %784 = vrot.lane.b32.xlu1 %v2028_v3, %s1870_s12  ;;  %v1470_v3 = vld [vmem:[%s2110_s2] sm:$0xff] }
 0x932   :  { %780 = vrot.lane.b32.xlu0 %v1982_v43, %s1871_s13  ;;  %v1768_v5 = vpack.c.bf16 %v1471_v4, %v1470_v3 }
 0x934   :  { %1769 = vmatprep.subr.bf16.mxu1 %v1768_v5 }
 0x935   :  { %1771 = vmatpush3.bf16.msra.mxu1 %v1768_v5 }
 0x999   :  { %v700_v51 = vpop.xlane.xlu1 %699 }
 0x99a   :  { %1823 = vrcp.f32 %v700_v51 }
 0x99d   :  { %v881_v52 = vpop.xlane.xlu0 %880 }
 0x99e   :  { %1825 = vrcp.f32 %v881_v52 }
 0x9a1   :  { %v1046_v53 = vpop.xlane.xlu1 %1045 }
 0x9a2   :  { %1827 = vrcp.f32 %v1046_v53 }
 0x9a4   :  { %v1824_v54 = vpop.eup %1823 }
 0x9a5   :  { %v702_v55 = vmul.f32 %v1824_v54, %v1814_v34  ;;  %v1211_v56 = vpop.xlane.xlu0 %1210 }
 0x9a6   :  { %1829 = vrcp.f32 %v1211_v56 }
 0x9a7   :  { %1715 = vmatmul.mubr.msk.f32.vlgmr.msra.gmra.mrb[4].mxu0 %vm122_vm2, %v702_v55 }
 0x9a8   :  { %v1826_v10 = vpop.eup %1825  ;;  %1723 = vmatpush3.msra.mxu0 %v885_v49  ;;  %1724 = vmatprep.mubr.msk.f32.mxu0 %vm1858_vm0, %v1857_v1 }
 0x9a9   :  { %v883_v43 = vmul.f32 %v1826_v10, %v1816_v38  ;;  %v1376_v57 = vpop.xlane.xlu1 %1375  ;;  %1732 = vmatprep.subr.mxu0 %v1857_v1  ;;  %v1215_v60 = vpop.permute.xlu0 %1214 }
 0x9aa   :  { %1831 = vrcp.f32 %v1376_v57 }
 0x9ab   :  { %1725 = vmatmul.mubr.msk.f32.vlgmr.msra.gmra.mrb[6].mxu0 %vm122_vm2, %v883_v43 }
 0x9ac   :  { %v1828_v58 = vpop.eup %1827  ;;  %1733 = vmatpush3.msra.mxu0 %v1050_v50  ;;  %1734 = vmatprep.mubr.msk.f32.mxu0 %vm1858_vm0, %v1857_v1 }
 0x9ad   :  { %v1048_v59 = vmul.f32 %v1828_v58, %v1818_v42  ;;  %1742 = vmatprep.subr.mxu0 %v1857_v1  ;;  %v1380_v63 = vpop.permute.xlu1 %1379  ;;  %v781_v20 = vpop.permute.xlu0 %780 }
 0x9ae   :  { %v791_v22 = vsel %vm122_vm2, %v1969_v28, %v781_v20 }
 0x9af   :  { %1735 = vmatmul.mubr.msk.f32.vlgmr.msra.gmra.mrb[8].mxu0 %vm122_vm2, %v1048_v59 }
 0x9b0   :  { %v1830_v61 = vpop.eup %1829  ;;  %1743 = vmatpush3.msra.mxu0 %v1215_v60  ;;  %1744 = vmatprep.mubr.msk.f32.mxu0 %vm1858_vm0, %v1857_v1 }
 0x9b1   :  { %v1213_v62 = vmul.f32 %v1830_v61, %v1820_v45  ;;  %1752 = vmatprep.subr.mxu0 %v1857_v1  ;;  %v785_v21 = vpop.permute.xlu1 %784 }
 0x9b2   :  { %v793_v23 = vsel %vm792_vm3, %v791_v22, %v785_v21 }
 0x9b3   :  { %1745 = vmatmul.mubr.msk.f32.vlgmr.msra.gmra.mrb[10].mxu0 %vm122_vm2, %v1213_v62 }
 0x9b4   :  { %v1832_v0 = vpop.eup %1831  ;;  %1753 = vmatpush3.msra.mxu0 %v1380_v63  ;;  %1754 = vmatprep.mubr.msk.f32.mxu0 %vm1858_vm0, %v1857_v1  ;;  %v1473_v1 = vld [vmem:[%s2110_s2 + $0x18] sm:$0xff] }
 0x9b5   :  { %v1378_v2 = vmul.f32 %v1832_v0, %v1822_v47  ;;  %v1772_v9 = vpack.c.bf16 %v1473_v1, %v1472_v6 }
 0x9b7   :  { %1755 = vmatmul.mubr.msk.f32.vlgmr.msra.gmra.mrb[12].mxu0 %vm122_vm2, %v1378_v2  ;;  %1773 = vmatprep.subr.bf16.mxu1 %v1772_v9 }
 0x9b8   :  { %1775 = vmatpush3.bf16.msra.mxu1 %v1772_v9 }
 0xa7a   :  { %v775_v7 = vpop.f32.mrb[4].mxu0 }
 0xa7b   :  { %788 = vrot.lane.b32.xlu1 %v775_v7, %s1872_s22  ;;  %v1716_v11 = vpop.f32.mrb[5].mxu0 }
 0xa7e   :  { %v956_v12 = vpop.f32.mrb[6].mxu0 }
 0xa7f   :  { %v1726_v13 = vpop.f32.mrb[7].mxu0 }
 0xa82   :  { %v1121_v14 = vpop.f32.mrb[8].mxu0 }
 0xa83   :  { %1456 = vrot.lane.b32.xlu0 %v1121_v14, %s1871_s13  ;;  %v1736_v15 = vpop.f32.mrb[9].mxu0 }
 0xa86   :  { %v1286_v16 = vpop.f32.mrb[10].mxu0 }
 0xa87   :  { %1460 = vrot.lane.b32.xlu0 %v1286_v16, %s1870_s12  ;;  %v1746_v17 = vpop.f32.mrb[11].mxu0 }
 0xa8a   :  { %v1451_v18 = vpop.f32.mrb[12].mxu0 }
 0xa8b   :  { %1464 = vrot.lane.b32.xlu1 %v1451_v18, %s1872_s22  ;;  %v1756_v19 = vpop.f32.mrb[13].mxu0 }
 0xaed   :  { %v789_v24 = vpop.permute.xlu1 %788 }
 0xaee   :  { %v795_v25 = vsel %vm794_vm4, %v793_v23, %v789_v24 }
 0xaef   :  { %1765 = vmatprep.mubr.msk.f32.mxu1 %vm1481_vm5, %v795_v25 }
 0xaf5   :  { %v1457_v26 = vpop.permute.xlu0 %1456 }
 0xaf6   :  { %v1467_v29 = vsel %vm122_vm2, %v956_v12, %v1457_v26 }
 0xaf9   :  { %v1461_v27 = vpop.permute.xlu0 %1460 }
 0xafa   :  { %v1468_v30 = vsel %vm792_vm3, %v1467_v29, %v1461_v27 }
 0xafd   :  { %v1465_v31 = vpop.permute.xlu1 %1464 }
 0xafe   :  { %v1469_v32 = vsel %vm794_vm4, %v1468_v30, %v1465_v31 }
 0xaff   :  { %1766 = vmatmul.mubr.msk.f32.vlgmr.msra.gmra.mrb[22].mxu1 %vm1481_vm5, %v1469_v32 }
 0xbd2   :  { %v1767_v28 = vpop.f32.mrb[22].mxu1 }
 0xbd3   :  { %v1560_v34 = vadd.f32 %v1767_v28, %v1613_v33  ;;  %v1554_v35 = vpop.f32.mrb[23].mxu1 }
 0xbd4   :  { %v1555_v36 = vadd.f32 %v1613_v33, %v1554_v35 }
 0xbd5   :  { %1564 = vst.msk [vmem:[#allocation2 + $0x8] sm:$0xff] %vm1481_vm5, %v1560_v34 }
 0xbd6   :  { %1563 = vst.msk [vmem:[#allocation2] sm:$0xff] %vm1481_vm5, %v1555_v36 }
 0xbd7   :  { %1844 = shalt.err (!%p1841_p4)
}
 0xbd8   :  { %s1845_s28 = scalar_lea.hbm %s2112_s4, 256 }
 0xbd9   :  { %p1846_p5 = scmp.ne.s32.totalorder %s2112_s4, %s1845_s28  ;;  %p1849_p6 = scmp.lt.u32.totalorder %s1845_s28, %s2112_s4 }
 0xbdb   :  { %p1851_p7 = pnand %p1849_p6, %p1846_p5 }
 0xbdd   :  { %1854 = shalt.err (!%p1851_p7)
}
 0xbde   :  { %s1874_s5 = smov 128  }
 0xbdf   :  { %1576 = dma.vmem_to_hbm [thread:$0]  %s1571_s25, 256, %s2112_s4, [#allocation3], %s1874_s5, %s1874_s5, %s1871_s13  }
 0xbe0   :  { %1855 = dma.done.wait [#allocation3], 256  }
 0xbe1   :  { %1856 = vsyncadd [#allocation3], 4294967040 }
 0xbe2   :  { %1580 = vsyncpa [#allocation3], 1 }

</bundles_post_ra>
